<compile_context>
chip_gen: v7x
topology: tpu7x:2x2x1
jax: 0.10.0
libtpu: 0.0.40
codegen_flags: <defaults>
</compile_context>

<pallas_src>
import functools

import jax
import jax.numpy as jnp
from jax import lax
from jax.experimental import pallas as pl
from jax.experimental.pallas import tpu as pltpu

HIDDEN = 32


def _round_up(x, m):
    return ((x + m - 1) // m) * m


# --------------------------------------------------------------------------
# Kernels
# --------------------------------------------------------------------------

def _lstm_head_kernel_bm(gx_ref, whh_ref, wd_ref, bd_ref, out_ref, *,
                         hidden, seq_len, unroll):
    """Batch-major recurrence (small B). State (Bt, H); gates (Bt, 4H).

    gx_ref:  (T, Bt, 4H) bf16  precomputed x @ W_ih^T + bias (g-block pre-scaled x2)
    whh_ref: (H, 4H)     bf16  hidden->gates weights (transposed, g-block x2)
    wd_ref:  (H, Ap)     bf16  dense weights (transposed, lane-padded)
    bd_ref:  (1, Ap)     f32   dense bias (lane-padded)
    out_ref: (Bt, Ap)    f32
    """
    H = hidden
    Bt = gx_ref.shape[1]
    whh = whh_ref[...]                      # VMEM-resident bf16

    def step(t, carry):
        h, c = carry                        # f32 (Bt, H)
        # Single bf16 MXU matmul on the serial path (f32 accumulate).
        gates = gx_ref[t] + jnp.dot(h.astype(jnp.bfloat16), whh,
                                    preferred_element_type=jnp.float32)
        # One full-width sigmoid pass; tanh(g) = 2*sigmoid(2g) - 1 via the
        # pre-scaled g-gate columns.  PyTorch gate order: i, f, g, o.
        sig = jax.nn.sigmoid(gates)
        i_g = sig[:, 0 * H:1 * H]
        f_g = sig[:, 1 * H:2 * H]
        g_g = 2.0 * sig[:, 2 * H:3 * H] - 1.0
        o_g = sig[:, 3 * H:4 * H]
        c_new = f_g * c + i_g * g_g
        h_new = o_g * jnp.tanh(c_new)
        return (h_new, c_new)

    h0 = jnp.zeros((Bt, H), jnp.float32)
    c0 = jnp.zeros((Bt, H), jnp.float32)
    h_last, _ = lax.fori_loop(0, seq_len, step, (h0, c0), unroll=unroll)

    feat = jnp.maximum(h_last, 0.0).astype(jnp.bfloat16)   # ReLU(last h)
    q = jnp.dot(feat, wd_ref[...], preferred_element_type=jnp.float32) + bd_ref[...]
    out_ref[...] = q.astype(out_ref.dtype)


def _lstm_head_kernel_fm(gx_ref, whh_ref, wd_ref, bd_ref, out_ref, *,
                         hidden, seq_len, unroll):
    """Feature-major recurrence (large B). State (H, Bt); gates (4H, Bt).

    Gate slices land on whole-vreg sublane boundaries and all h/c elementwise
    work (plus tanh(c)) is lane-dense across the batch.

    gx_ref:  (T, 4H, Bt) bf16
    whh_ref: (4H, H)     bf16 (PyTorch layout, g-block rows pre-scaled x2)
    wd_ref:  (Ap, H)     bf16
    bd_ref:  (Ap, 1)     f32
    out_ref: (Ap, Bt)    f32
    """
    H = hidden
    Bt = gx_ref.shape[2]
    whh = whh_ref[...]

    def step(t, carry):
        h, c = carry                        # f32 (H, Bt)
        gates = gx_ref[t] + jnp.dot(whh, h.astype(jnp.bfloat16),
                                    preferred_element_type=jnp.float32)
        sig = jax.nn.sigmoid(gates)
        i_g = sig[0 * H:1 * H, :]
        f_g = sig[1 * H:2 * H, :]
        g_g = 2.0 * sig[2 * H:3 * H, :] - 1.0
        o_g = sig[3 * H:4 * H, :]
        c_new = f_g * c + i_g * g_g
        h_new = o_g * jnp.tanh(c_new)
        return (h_new, c_new)

    h0 = jnp.zeros((H, Bt), jnp.float32)
    c0 = jnp.zeros((H, Bt), jnp.float32)
    h_last, _ = lax.fori_loop(0, seq_len, step, (h0, c0), unroll=unroll)

    feat = jnp.maximum(h_last, 0.0).astype(jnp.bfloat16)
    q = jnp.dot(wd_ref[...], feat, preferred_element_type=jnp.float32) + bd_ref[...]
    out_ref[...] = q.astype(out_ref.dtype)


# --------------------------------------------------------------------------
# Wrapper
# --------------------------------------------------------------------------

def simple_finance_model_forward(x, params):
    """x: (B, T, num_states) float32 -> (B, num_actions) float32."""
    B, T, S = x.shape
    H = HIDDEN
    G = 4 * H
    A = params["w_dense"].shape[0]

    # tanh-from-sigmoid trick: scale ONLY the g-gate block (rows 2H:3H of the
    # PyTorch (4H, .) weights and of the combined bias) by 2.
    g_scale = jnp.ones((G, 1), jnp.float32).at[2 * H:3 * H, :].set(2.0)
    w_ih_s = params["w_ih"].astype(jnp.float32) * g_scale          # (4H, S)
    w_hh_s = params["w_hh"].astype(jnp.float32) * g_scale          # (4H, H)
    b_s = (params["b_ih"] + params["b_hh"]).astype(jnp.float32) * g_scale[:, 0]

    xf = x.astype(jnp.float32)
    wb_dt = jnp.bfloat16
    budget = 6 * 1024 * 1024           # per-buffer budget for the streamed gx
    unroll_cfg = True if T <= 16 else 8
    use_feature_major = B >= 128

    if not use_feature_major:
        # -------- batch-major path (small B) --------
        # Hoisted input projection: one XLA matmul, time-major output, default
        # precision, streamed to the kernel as bf16.
        gx = (jnp.einsum("bts,sg->tbg", xf, w_ih_s.T) +
              b_s.reshape(1, 1, G)).astype(wb_dt)                  # (T, B, 4H)
        whh = w_hh_s.T.astype(wb_dt)                               # (H, 4H)
        a_pad = _round_up(A, 128)                                  # lane-dense store
        wd = jnp.pad(params["w_dense"].astype(jnp.float32).T,
                     ((0, 0), (0, a_pad - A))).astype(wb_dt)       # (H, Ap)
        bd = jnp.pad(params["b_dense"].astype(jnp.float32).reshape(1, -1),
                     ((0, 0), (0, a_pad - A)))                     # (1, Ap) f32

        if B >= 16:
            # at least 2 batch blocks so v7x's second TensorCore gets work
            b_tile = _round_up(pl.cdiv(B, 2), 8)
        else:
            b_tile = B
        row_bytes = T * G * 2
        while b_tile > 8 and b_tile * row_bytes > budget:
            b_tile = _round_up(pl.cdiv(b_tile, 2), 8)
        grid = (pl.cdiv(B, b_tile),)

        gx_blk = T * b_tile * G * 2
        out_blk = b_tile * a_pad * 4
        w_bytes = whh.size * 2 + wd.size * 2 + bd.size * 4
        vmem_limit = int(min(32 * 2**20,
                             max(16 * 2**20,
                                 2 * gx_blk + 2 * out_blk + w_bytes + 8 * 2**20)))

        kernel = functools.partial(_lstm_head_kernel_bm, hidden=H,
                                   seq_len=T, unroll=unroll_cfg)
        out = pl.pallas_call(
            kernel,
            out_shape=jax.ShapeDtypeStruct((B, a_pad), jnp.float32),
            grid=grid,
            in_specs=[
                pl.BlockSpec((T, b_tile, G), lambda i: (0, i, 0)),  # gx, pipelined
                pl.BlockSpec((H, G), lambda i: (0, 0)),             # whh resident
                pl.BlockSpec((H, a_pad), lambda i: (0, 0)),          # dense W resident
                pl.BlockSpec((1, a_pad), lambda i: (0, 0)),          # dense b resident
            ],
            out_specs=pl.BlockSpec((b_tile, a_pad), lambda i: (i, 0)),
            compiler_params=pltpu.CompilerParams(
                dimension_semantics=("parallel",),
                vmem_limit_bytes=vmem_limit),
        )(gx, whh, wd, bd)
        return out[:, :A]

    # -------- feature-major path (B >= 128): batch in lanes --------
    gx = (jnp.einsum("bts,gs->tgb", xf, w_ih_s) +
          b_s.reshape(1, G, 1)).astype(wb_dt)                      # (T, 4H, B)
    whh = w_hh_s.astype(wb_dt)                                     # (4H, H)
    a_pad = _round_up(A, 8)
    wd = jnp.pad(params["w_dense"].astype(jnp.float32),
                 ((0, a_pad - A), (0, 0))).astype(wb_dt)           # (Ap, H)
    bd = jnp.pad(params["b_dense"].astype(jnp.float32).reshape(-1, 1),
                 ((0, a_pad - A), (0, 0)))                         # (Ap, 1) f32

    bt = max(128, min((budget // (T * G * 2)) // 128 * 128,
                      (B // 128) * 128))
    if B >= 256:
        bt = min(bt, _round_up(pl.cdiv(B, 2), 128))                # >= 2 blocks (v7x)
    grid = (pl.cdiv(B, bt),)

    gx_blk = T * G * bt * 2
    out_blk = a_pad * bt * 4
    w_bytes = whh.size * 2 + wd.size * 2 + bd.size * 4
    vmem_limit = int(min(32 * 2**20,
                         max(16 * 2**20,
                             2 * gx_blk + 2 * out_blk + w_bytes + 8 * 2**20)))

    kernel = functools.partial(_lstm_head_kernel_fm, hidden=H,
                               seq_len=T, unroll=unroll_cfg)
    out = pl.pallas_call(
        kernel,
        out_shape=jax.ShapeDtypeStruct((a_pad, B), jnp.float32),
        grid=grid,
        in_specs=[
            pl.BlockSpec((T, G, bt), lambda i: (0, 0, i)),          # gx, pipelined
            pl.BlockSpec((G, H), lambda i: (0, 0)),                 # whh resident
            pl.BlockSpec((a_pad, H), lambda i: (0, 0)),             # dense W resident
            pl.BlockSpec((a_pad, 1), lambda i: (0, 0)),             # dense b resident
        ],
        out_specs=pl.BlockSpec((a_pad, bt), lambda i: (0, i)),
        compiler_params=pltpu.CompilerParams(
            dimension_semantics=("parallel",),
            vmem_limit_bytes=vmem_limit),
    )(gx, whh, wd, bd)
    return out[:A, :].T


# --------------------------------------------------------------------------
# Init + reference
# --------------------------------------------------------------------------

def init_params(key, num_states, num_actions, hidden=HIDDEN):
    """Deterministic init mirroring PyTorch's uniform(-1/sqrt(H), 1/sqrt(H))."""
    ks = jax.random.split(key, 6)
    bound = 1.0 / jnp.sqrt(hidden)
    u = lambda k, shape: jax.random.uniform(
        k, shape, dtype=jnp.float32, minval=-bound, maxval=bound)
    return {
        "w_ih": u(ks[0], (4 * hidden, num_states)),   # PyTorch weight_ih_l0
        "w_hh": u(ks[1], (4 * hidden, hidden)),        # PyTorch weight_hh_l0
        "b_ih": u(ks[2], (4 * hidden,)),
        "b_hh": u(ks[3], (4 * hidden,)),
        "w_dense": u(ks[4], (num_actions, hidden)),    # nn.Linear(32, A).weight
        "b_dense": u(ks[5], (num_actions,)),
    }


def _reference_forward(x, params):
    """Pure-JAX f32 reference (same math as torch nn.LSTM + Linear)."""
    H = HIDDEN
    wih_t = params["w_ih"].T
    whh_t = params["w_hh"].T
    b = params["b_ih"] + params["b_hh"]

    def step(carry, x_t):
        h, c = carry
        gates = x_t @ wih_t + h @ whh_t + b
        i_g = jax.nn.sigmoid(gates[:, 0 * H:1 * H])
        f_g = jax.nn.sigmoid(gates[:, 1 * H:2 * H])
        g_g = jnp.tanh(gates[:, 2 * H:3 * H])
        o_g = jax.nn.sigmoid(gates[:, 3 * H:4 * H])
        c = f_g * c + i_g * g_g
        h = o_g * jnp.tanh(c)
        return (h, c), None

    B = x.shape[0]
    init = (jnp.zeros((B, H), jnp.float32), jnp.zeros((B, H), jnp.float32))
    (h_last, _), _ = lax.scan(step, init, jnp.transpose(x, (1, 0, 2)))
    feat = jnp.maximum(h_last, 0.0)
    return feat @ params["w_dense"].T + params["b_dense"]


if __name__ == "__main__":
    batch, seq, num_states, num_actions = 2, 8, 4, 3

    key = jax.random.PRNGKey(0)
    k_param, k_x, k_x2 = jax.random.split(key, 3)
    params = init_params(k_param, num_states, num_actions)

    # Primary small-shape run (batch-major path).
    x = jax.random.normal(k_x, (batch, seq, num_states), dtype=jnp.float32)
    out = jax.block_until_ready(simple_finance_model_forward(x, params))
    ref = jax.block_until_ready(_reference_forward(x, params))
    assert out.shape == (batch, num_actions)
    assert jnp.allclose(out, ref, rtol=5e-3, atol=5e-3)

    # Secondary verification of the large-batch feature-major path (B >= 128).
    x_big = jax.random.normal(k_x2, (256, seq, num_states), dtype=jnp.float32)
    out_big = jax.block_until_ready(simple_finance_model_forward(x_big, params))
    ref_big = jax.block_until_ready(_reference_forward(x_big, params))
    assert out_big.shape == (256, num_actions)
    assert jnp.allclose(out_big, ref_big, rtol=5e-3, atol=5e-3)

    print("KERNEL_OK")
</pallas_src>

<mosaic_0001>
module attributes {stable_mosaic.version = 11 : i64} {
  func.func @_lstm_head_kernel_bm(%arg0: i32, %arg1: memref<8x2x128xbf16, #tpu.memory_space<vmem>>, %arg2: memref<32x128xbf16, #tpu.memory_space<vmem>>, %arg3: memref<32x128xbf16, #tpu.memory_space<vmem>>, %arg4: memref<1x128xf32, #tpu.memory_space<vmem>>, %arg5: memref<2x128xf32, #tpu.memory_space<vmem>>) attributes {dimension_semantics = [#tpu.dimension_semantics<parallel>], iteration_bounds = array<i64: 1>, scalar_prefetch = 0 : i64, scratch_operands = 0 : i64, tpu.core_type = #tpu.core_type<tc>, window_params = [{transform_indices = @transform_0, window_bounds = array<i64: 8, 2, 128>}, {pipeline_mode = #tpu.pipeline_mode<synchronous>, transform_indices = @transform_1, window_bounds = array<i64: 32, 128>}, {pipeline_mode = #tpu.pipeline_mode<synchronous>, transform_indices = @transform_2, window_bounds = array<i64: 32, 128>}, {pipeline_mode = #tpu.pipeline_mode<synchronous>, transform_indices = @transform_3, window_bounds = array<i64: 1, 128>}, {transform_indices = @transform_4, window_bounds = array<i64: 2, 128>}]} {
    %c0 = arith.constant 0 : index
    %c0_0 = arith.constant 0 : index
    %0 = vector.load %arg2[%c0, %c0_0] : memref<32x128xbf16, #tpu.memory_space<vmem>>, vector<32x128xbf16>
    %cst = arith.constant 0.000000e+00 : f32
    %1 = vector.broadcast %cst : f32 to vector<2x32xf32>
    %cst_1 = arith.constant 0.000000e+00 : f32
    %2 = vector.broadcast %cst_1 : f32 to vector<2x32xf32>
    %c0_i32 = arith.constant 0 : i32
    %3 = arith.index_cast %c0_i32 : i32 to index
    %c0_2 = arith.constant 0 : index
    %c0_3 = arith.constant 0 : index
    %4 = vector.load %arg1[%3, %c0_2, %c0_3] : memref<8x2x128xbf16, #tpu.memory_space<vmem>>, vector<1x2x128xbf16>
    %5 = vector.shape_cast %4 : vector<1x2x128xbf16> to vector<2x128xbf16>
    %6 = arith.truncf %1 : vector<2x32xf32> to vector<2x32xbf16>
    %cst_4 = arith.constant dense<0.000000e+00> : vector<2x128xf32>
    %7 = tpu.matmul %6, %0, %cst_4 {dimension_numbers = #tpu.dot_dimension_numbers<[1], [0], [0], [1], [0, 0, 1, 1], [], []>} : vector<2x32xbf16>, vector<32x128xbf16>, vector<2x128xf32> -> vector<2x128xf32>
    %8 = arith.extf %5 : vector<2x128xbf16> to vector<2x128xf32>
    %9 = arith.addf %8, %7 : vector<2x128xf32>
    %10 = arith.negf %9 : vector<2x128xf32>
    %11 = math.exp %10 : vector<2x128xf32>
    %cst_5 = arith.constant 1.000000e+00 : f32
    %12 = vector.broadcast %cst_5 : f32 to vector<2x128xf32>
    %13 = arith.addf %12, %11 : vector<2x128xf32>
    %14 = arith.divf %12, %13 : vector<2x128xf32>
    %15 = vector.extract_strided_slice %14 {offsets = [0, 0], sizes = [2, 32], strides = [1, 1]} : vector<2x128xf32> to vector<2x32xf32>
    %16 = vector.extract_strided_slice %14 {offsets = [0, 32], sizes = [2, 32], strides = [1, 1]} : vector<2x128xf32> to vector<2x32xf32>
    %17 = vector.extract_strided_slice %14 {offsets = [0, 64], sizes = [2, 32], strides = [1, 1]} : vector<2x128xf32> to vector<2x32xf32>
    %cst_6 = arith.constant 2.000000e+00 : f32
    %18 = vector.broadcast %cst_6 : f32 to vector<2x32xf32>
    %19 = arith.mulf %18, %17 : vector<2x32xf32>
    %cst_7 = arith.constant 1.000000e+00 : f32
    %20 = vector.broadcast %cst_7 : f32 to vector<2x32xf32>
    %21 = arith.subf %19, %20 : vector<2x32xf32>
    %22 = vector.extract_strided_slice %14 {offsets = [0, 96], sizes = [2, 32], strides = [1, 1]} : vector<2x128xf32> to vector<2x32xf32>
    %23 = arith.mulf %16, %2 : vector<2x32xf32>
    %24 = arith.mulf %15, %21 : vector<2x32xf32>
    %25 = arith.addf %23, %24 : vector<2x32xf32>
    %26 = math.tanh %25 : vector<2x32xf32>
    %27 = arith.mulf %22, %26 : vector<2x32xf32>
    %c1_i32 = arith.constant 1 : i32
    %28 = arith.index_cast %c1_i32 : i32 to index
    %c0_8 = arith.constant 0 : index
    %c0_9 = arith.constant 0 : index
    %29 = vector.load %arg1[%28, %c0_8, %c0_9] : memref<8x2x128xbf16, #tpu.memory_space<vmem>>, vector<1x2x128xbf16>
    %30 = vector.shape_cast %29 : vector<1x2x128xbf16> to vector<2x128xbf16>
    %31 = arith.truncf %27 : vector<2x32xf32> to vector<2x32xbf16>
    %cst_10 = arith.constant dense<0.000000e+00> : vector<2x128xf32>
    %32 = tpu.matmul %31, %0, %cst_10 {dimension_numbers = #tpu.dot_dimension_numbers<[1], [0], [0], [1], [0, 0, 1, 1], [], []>} : vector<2x32xbf16>, vector<32x128xbf16>, vector<2x128xf32> -> vector<2x128xf32>
    %33 = arith.extf %30 : vector<2x128xbf16> to vector<2x128xf32>
    %34 = arith.addf %33, %32 : vector<2x128xf32>
    %35 = arith.negf %34 : vector<2x128xf32>
    %36 = math.exp %35 : vector<2x128xf32>
    %cst_11 = arith.constant 1.000000e+00 : f32
    %37 = vector.broadcast %cst_11 : f32 to vector<2x128xf32>
    %38 = arith.addf %37, %36 : vector<2x128xf32>
    %39 = arith.divf %37, %38 : vector<2x128xf32>
    %40 = vector.extract_strided_slice %39 {offsets = [0, 0], sizes = [2, 32], strides = [1, 1]} : vector<2x128xf32> to vector<2x32xf32>
    %41 = vector.extract_strided_slice %39 {offsets = [0, 32], sizes = [2, 32], strides = [1, 1]} : vector<2x128xf32> to vector<2x32xf32>
    %42 = vector.extract_strided_slice %39 {offsets = [0, 64], sizes = [2, 32], strides = [1, 1]} : vector<2x128xf32> to vector<2x32xf32>
    %cst_12 = arith.constant 2.000000e+00 : f32
    %43 = vector.broadcast %cst_12 : f32 to vector<2x32xf32>
    %44 = arith.mulf %43, %42 : vector<2x32xf32>
    %cst_13 = arith.constant 1.000000e+00 : f32
    %45 = vector.broadcast %cst_13 : f32 to vector<2x32xf32>
    %46 = arith.subf %44, %45 : vector<2x32xf32>
    %47 = vector.extract_strided_slice %39 {offsets = [0, 96], sizes = [2, 32], strides = [1, 1]} : vector<2x128xf32> to vector<2x32xf32>
    %48 = arith.mulf %41, %25 : vector<2x32xf32>
    %49 = arith.mulf %40, %46 : vector<2x32xf32>
    %50 = arith.addf %48, %49 : vector<2x32xf32>
    %51 = math.tanh %50 : vector<2x32xf32>
    %52 = arith.mulf %47, %51 : vector<2x32xf32>
    %c2_i32 = arith.constant 2 : i32
    %53 = arith.index_cast %c2_i32 : i32 to index
    %c0_14 = arith.constant 0 : index
    %c0_15 = arith.constant 0 : index
    %54 = vector.load %arg1[%53, %c0_14, %c0_15] : memref<8x2x128xbf16, #tpu.memory_space<vmem>>, vector<1x2x128xbf16>
    %55 = vector.shape_cast %54 : vector<1x2x128xbf16> to vector<2x128xbf16>
    %56 = arith.truncf %52 : vector<2x32xf32> to vector<2x32xbf16>
    %cst_16 = arith.constant dense<0.000000e+00> : vector<2x128xf32>
    %57 = tpu.matmul %56, %0, %cst_16 {dimension_numbers = #tpu.dot_dimension_numbers<[1], [0], [0], [1], [0, 0, 1, 1], [], []>} : vector<2x32xbf16>, vector<32x128xbf16>, vector<2x128xf32> -> vector<2x128xf32>
    %58 = arith.extf %55 : vector<2x128xbf16> to vector<2x128xf32>
    %59 = arith.addf %58, %57 : vector<2x128xf32>
    %60 = arith.negf %59 : vector<2x128xf32>
    %61 = math.exp %60 : vector<2x128xf32>
    %cst_17 = arith.constant 1.000000e+00 : f32
    %62 = vector.broadcast %cst_17 : f32 to vector<2x128xf32>
    %63 = arith.addf %62, %61 : vector<2x128xf32>
    %64 = arith.divf %62, %63 : vector<2x128xf32>
    %65 = vector.extract_strided_slice %64 {offsets = [0, 0], sizes = [2, 32], strides = [1, 1]} : vector<2x128xf32> to vector<2x32xf32>
    %66 = vector.extract_strided_slice %64 {offsets = [0, 32], sizes = [2, 32], strides = [1, 1]} : vector<2x128xf32> to vector<2x32xf32>
    %67 = vector.extract_strided_slice %64 {offsets = [0, 64], sizes = [2, 32], strides = [1, 1]} : vector<2x128xf32> to vector<2x32xf32>
    %cst_18 = arith.constant 2.000000e+00 : f32
    %68 = vector.broadcast %cst_18 : f32 to vector<2x32xf32>
    %69 = arith.mulf %68, %67 : vector<2x32xf32>
    %cst_19 = arith.constant 1.000000e+00 : f32
    %70 = vector.broadcast %cst_19 : f32 to vector<2x32xf32>
    %71 = arith.subf %69, %70 : vector<2x32xf32>
    %72 = vector.extract_strided_slice %64 {offsets = [0, 96], sizes = [2, 32], strides = [1, 1]} : vector<2x128xf32> to vector<2x32xf32>
    %73 = arith.mulf %66, %50 : vector<2x32xf32>
    %74 = arith.mulf %65, %71 : vector<2x32xf32>
    %75 = arith.addf %73, %74 : vector<2x32xf32>
    %76 = math.tanh %75 : vector<2x32xf32>
    %77 = arith.mulf %72, %76 : vector<2x32xf32>
    %c3_i32 = arith.constant 3 : i32
    %78 = arith.index_cast %c3_i32 : i32 to index
    %c0_20 = arith.constant 0 : index
    %c0_21 = arith.constant 0 : index
    %79 = vector.load %arg1[%78, %c0_20, %c0_21] : memref<8x2x128xbf16, #tpu.memory_space<vmem>>, vector<1x2x128xbf16>
    %80 = vector.shape_cast %79 : vector<1x2x128xbf16> to vector<2x128xbf16>
    %81 = arith.truncf %77 : vector<2x32xf32> to vector<2x32xbf16>
    %cst_22 = arith.constant dense<0.000000e+00> : vector<2x128xf32>
    %82 = tpu.matmul %81, %0, %cst_22 {dimension_numbers = #tpu.dot_dimension_numbers<[1], [0], [0], [1], [0, 0, 1, 1], [], []>} : vector<2x32xbf16>, vector<32x128xbf16>, vector<2x128xf32> -> vector<2x128xf32>
    %83 = arith.extf %80 : vector<2x128xbf16> to vector<2x128xf32>
    %84 = arith.addf %83, %82 : vector<2x128xf32>
    %85 = arith.negf %84 : vector<2x128xf32>
    %86 = math.exp %85 : vector<2x128xf32>
    %cst_23 = arith.constant 1.000000e+00 : f32
    %87 = vector.broadcast %cst_23 : f32 to vector<2x128xf32>
    %88 = arith.addf %87, %86 : vector<2x128xf32>
    %89 = arith.divf %87, %88 : vector<2x128xf32>
    %90 = vector.extract_strided_slice %89 {offsets = [0, 0], sizes = [2, 32], strides = [1, 1]} : vector<2x128xf32> to vector<2x32xf32>
    %91 = vector.extract_strided_slice %89 {offsets = [0, 32], sizes = [2, 32], strides = [1, 1]} : vector<2x128xf32> to vector<2x32xf32>
    %92 = vector.extract_strided_slice %89 {offsets = [0, 64], sizes = [2, 32], strides = [1, 1]} : vector<2x128xf32> to vector<2x32xf32>
    %cst_24 = arith.constant 2.000000e+00 : f32
    %93 = vector.broadcast %cst_24 : f32 to vector<2x32xf32>
    %94 = arith.mulf %93, %92 : vector<2x32xf32>
    %cst_25 = arith.constant 1.000000e+00 : f32
    %95 = vector.broadcast %cst_25 : f32 to vector<2x32xf32>
    %96 = arith.subf %94, %95 : vector<2x32xf32>
    %97 = vector.extract_strided_slice %89 {offsets = [0, 96], sizes = [2, 32], strides = [1, 1]} : vector<2x128xf32> to vector<2x32xf32>
    %98 = arith.mulf %91, %75 : vector<2x32xf32>
    %99 = arith.mulf %90, %96 : vector<2x32xf32>
    %100 = arith.addf %98, %99 : vector<2x32xf32>
    %101 = math.tanh %100 : vector<2x32xf32>
    %102 = arith.mulf %97, %101 : vector<2x32xf32>
    %c4_i32 = arith.constant 4 : i32
    %103 = arith.index_cast %c4_i32 : i32 to index
    %c0_26 = arith.constant 0 : index
    %c0_27 = arith.constant 0 : index
    %104 = vector.load %arg1[%103, %c0_26, %c0_27] : memref<8x2x128xbf16, #tpu.memory_space<vmem>>, vector<1x2x128xbf16>
    %105 = vector.shape_cast %104 : vector<1x2x128xbf16> to vector<2x128xbf16>
    %106 = arith.truncf %102 : vector<2x32xf32> to vector<2x32xbf16>
    %cst_28 = arith.constant dense<0.000000e+00> : vector<2x128xf32>
    %107 = tpu.matmul %106, %0, %cst_28 {dimension_numbers = #tpu.dot_dimension_numbers<[1], [0], [0], [1], [0, 0, 1, 1], [], []>} : vector<2x32xbf16>, vector<32x128xbf16>, vector<2x128xf32> -> vector<2x128xf32>
    %108 = arith.extf %105 : vector<2x128xbf16> to vector<2x128xf32>
    %109 = arith.addf %108, %107 : vector<2x128xf32>
    %110 = arith.negf %109 : vector<2x128xf32>
    %111 = math.exp %110 : vector<2x128xf32>
    %cst_29 = arith.constant 1.000000e+00 : f32
    %112 = vector.broadcast %cst_29 : f32 to vector<2x128xf32>
    %113 = arith.addf %112, %111 : vector<2x128xf32>
    %114 = arith.divf %112, %113 : vector<2x128xf32>
    %115 = vector.extract_strided_slice %114 {offsets = [0, 0], sizes = [2, 32], strides = [1, 1]} : vector<2x128xf32> to vector<2x32xf32>
    %116 = vector.extract_strided_slice %114 {offsets = [0, 32], sizes = [2, 32], strides = [1, 1]} : vector<2x128xf32> to vector<2x32xf32>
    %117 = vector.extract_strided_slice %114 {offsets = [0, 64], sizes = [2, 32], strides = [1, 1]} : vector<2x128xf32> to vector<2x32xf32>
    %cst_30 = arith.constant 2.000000e+00 : f32
    %118 = vector.broadcast %cst_30 : f32 to vector<2x32xf32>
    %119 = arith.mulf %118, %117 : vector<2x32xf32>
    %cst_31 = arith.constant 1.000000e+00 : f32
    %120 = vector.broadcast %cst_31 : f32 to vector<2x32xf32>
    %121 = arith.subf %119, %120 : vector<2x32xf32>
    %122 = vector.extract_strided_slice %114 {offsets = [0, 96], sizes = [2, 32], strides = [1, 1]} : vector<2x128xf32> to vector<2x32xf32>
    %123 = arith.mulf %116, %100 : vector<2x32xf32>
    %124 = arith.mulf %115, %121 : vector<2x32xf32>
    %125 = arith.addf %123, %124 : vector<2x32xf32>
    %126 = math.tanh %125 : vector<2x32xf32>
    %127 = arith.mulf %122, %126 : vector<2x32xf32>
    %c5_i32 = arith.constant 5 : i32
    %128 = arith.index_cast %c5_i32 : i32 to index
    %c0_32 = arith.constant 0 : index
    %c0_33 = arith.constant 0 : index
    %129 = vector.load %arg1[%128, %c0_32, %c0_33] : memref<8x2x128xbf16, #tpu.memory_space<vmem>>, vector<1x2x128xbf16>
    %130 = vector.shape_cast %129 : vector<1x2x128xbf16> to vector<2x128xbf16>
    %131 = arith.truncf %127 : vector<2x32xf32> to vector<2x32xbf16>
    %cst_34 = arith.constant dense<0.000000e+00> : vector<2x128xf32>
    %132 = tpu.matmul %131, %0, %cst_34 {dimension_numbers = #tpu.dot_dimension_numbers<[1], [0], [0], [1], [0, 0, 1, 1], [], []>} : vector<2x32xbf16>, vector<32x128xbf16>, vector<2x128xf32> -> vector<2x128xf32>
    %133 = arith.extf %130 : vector<2x128xbf16> to vector<2x128xf32>
    %134 = arith.addf %133, %132 : vector<2x128xf32>
    %135 = arith.negf %134 : vector<2x128xf32>
    %136 = math.exp %135 : vector<2x128xf32>
    %cst_35 = arith.constant 1.000000e+00 : f32
    %137 = vector.broadcast %cst_35 : f32 to vector<2x128xf32>
    %138 = arith.addf %137, %136 : vector<2x128xf32>
    %139 = arith.divf %137, %138 : vector<2x128xf32>
    %140 = vector.extract_strided_slice %139 {offsets = [0, 0], sizes = [2, 32], strides = [1, 1]} : vector<2x128xf32> to vector<2x32xf32>
    %141 = vector.extract_strided_slice %139 {offsets = [0, 32], sizes = [2, 32], strides = [1, 1]} : vector<2x128xf32> to vector<2x32xf32>
    %142 = vector.extract_strided_slice %139 {offsets = [0, 64], sizes = [2, 32], strides = [1, 1]} : vector<2x128xf32> to vector<2x32xf32>
    %cst_36 = arith.constant 2.000000e+00 : f32
    %143 = vector.broadcast %cst_36 : f32 to vector<2x32xf32>
    %144 = arith.mulf %143, %142 : vector<2x32xf32>
    %cst_37 = arith.constant 1.000000e+00 : f32
    %145 = vector.broadcast %cst_37 : f32 to vector<2x32xf32>
    %146 = arith.subf %144, %145 : vector<2x32xf32>
    %147 = vector.extract_strided_slice %139 {offsets = [0, 96], sizes = [2, 32], strides = [1, 1]} : vector<2x128xf32> to vector<2x32xf32>
    %148 = arith.mulf %141, %125 : vector<2x32xf32>
    %149 = arith.mulf %140, %146 : vector<2x32xf32>
    %150 = arith.addf %148, %149 : vector<2x32xf32>
    %151 = math.tanh %150 : vector<2x32xf32>
    %152 = arith.mulf %147, %151 : vector<2x32xf32>
    %c6_i32 = arith.constant 6 : i32
    %153 = arith.index_cast %c6_i32 : i32 to index
    %c0_38 = arith.constant 0 : index
    %c0_39 = arith.constant 0 : index
    %154 = vector.load %arg1[%153, %c0_38, %c0_39] : memref<8x2x128xbf16, #tpu.memory_space<vmem>>, vector<1x2x128xbf16>
    %155 = vector.shape_cast %154 : vector<1x2x128xbf16> to vector<2x128xbf16>
    %156 = arith.truncf %152 : vector<2x32xf32> to vector<2x32xbf16>
    %cst_40 = arith.constant dense<0.000000e+00> : vector<2x128xf32>
    %157 = tpu.matmul %156, %0, %cst_40 {dimension_numbers = #tpu.dot_dimension_numbers<[1], [0], [0], [1], [0, 0, 1, 1], [], []>} : vector<2x32xbf16>, vector<32x128xbf16>, vector<2x128xf32> -> vector<2x128xf32>
    %158 = arith.extf %155 : vector<2x128xbf16> to vector<2x128xf32>
    %159 = arith.addf %158, %157 : vector<2x128xf32>
    %160 = arith.negf %159 : vector<2x128xf32>
    %161 = math.exp %160 : vector<2x128xf32>
    %cst_41 = arith.constant 1.000000e+00 : f32
    %162 = vector.broadcast %cst_41 : f32 to vector<2x128xf32>
    %163 = arith.addf %162, %161 : vector<2x128xf32>
    %164 = arith.divf %162, %163 : vector<2x128xf32>
    %165 = vector.extract_strided_slice %164 {offsets = [0, 0], sizes = [2, 32], strides = [1, 1]} : vector<2x128xf32> to vector<2x32xf32>
    %166 = vector.extract_strided_slice %164 {offsets = [0, 32], sizes = [2, 32], strides = [1, 1]} : vector<2x128xf32> to vector<2x32xf32>
    %167 = vector.extract_strided_slice %164 {offsets = [0, 64], sizes = [2, 32], strides = [1, 1]} : vector<2x128xf32> to vector<2x32xf32>
    %cst_42 = arith.constant 2.000000e+00 : f32
    %168 = vector.broadcast %cst_42 : f32 to vector<2x32xf32>
    %169 = arith.mulf %168, %167 : vector<2x32xf32>
    %cst_43 = arith.constant 1.000000e+00 : f32
    %170 = vector.broadcast %cst_43 : f32 to vector<2x32xf32>
    %171 = arith.subf %169, %170 : vector<2x32xf32>
    %172 = vector.extract_strided_slice %164 {offsets = [0, 96], sizes = [2, 32], strides = [1, 1]} : vector<2x128xf32> to vector<2x32xf32>
    %173 = arith.mulf %166, %150 : vector<2x32xf32>
    %174 = arith.mulf %165, %171 : vector<2x32xf32>
    %175 = arith.addf %173, %174 : vector<2x32xf32>
    %176 = math.tanh %175 : vector<2x32xf32>
    %177 = arith.mulf %172, %176 : vector<2x32xf32>
    %c7_i32 = arith.constant 7 : i32
    %178 = arith.index_cast %c7_i32 : i32 to index
    %c0_44 = arith.constant 0 : index
    %c0_45 = arith.constant 0 : index
    %179 = vector.load %arg1[%178, %c0_44, %c0_45] : memref<8x2x128xbf16, #tpu.memory_space<vmem>>, vector<1x2x128xbf16>
    %180 = vector.shape_cast %179 : vector<1x2x128xbf16> to vector<2x128xbf16>
    %181 = arith.truncf %177 : vector<2x32xf32> to vector<2x32xbf16>
    %cst_46 = arith.constant dense<0.000000e+00> : vector<2x128xf32>
    %182 = tpu.matmul %181, %0, %cst_46 {dimension_numbers = #tpu.dot_dimension_numbers<[1], [0], [0], [1], [0, 0, 1, 1], [], []>} : vector<2x32xbf16>, vector<32x128xbf16>, vector<2x128xf32> -> vector<2x128xf32>
    %183 = arith.extf %180 : vector<2x128xbf16> to vector<2x128xf32>
    %184 = arith.addf %183, %182 : vector<2x128xf32>
    %185 = arith.negf %184 : vector<2x128xf32>
    %186 = math.exp %185 : vector<2x128xf32>
    %cst_47 = arith.constant 1.000000e+00 : f32
    %187 = vector.broadcast %cst_47 : f32 to vector<2x128xf32>
    %188 = arith.addf %187, %186 : vector<2x128xf32>
    %189 = arith.divf %187, %188 : vector<2x128xf32>
    %190 = vector.extract_strided_slice %189 {offsets = [0, 0], sizes = [2, 32], strides = [1, 1]} : vector<2x128xf32> to vector<2x32xf32>
    %191 = vector.extract_strided_slice %189 {offsets = [0, 32], sizes = [2, 32], strides = [1, 1]} : vector<2x128xf32> to vector<2x32xf32>
    %192 = vector.extract_strided_slice %189 {offsets = [0, 64], sizes = [2, 32], strides = [1, 1]} : vector<2x128xf32> to vector<2x32xf32>
    %cst_48 = arith.constant 2.000000e+00 : f32
    %193 = vector.broadcast %cst_48 : f32 to vector<2x32xf32>
    %194 = arith.mulf %193, %192 : vector<2x32xf32>
    %cst_49 = arith.constant 1.000000e+00 : f32
    %195 = vector.broadcast %cst_49 : f32 to vector<2x32xf32>
    %196 = arith.subf %194, %195 : vector<2x32xf32>
    %197 = vector.extract_strided_slice %189 {offsets = [0, 96], sizes = [2, 32], strides = [1, 1]} : vector<2x128xf32> to vector<2x32xf32>
    %198 = arith.mulf %191, %175 : vector<2x32xf32>
    %199 = arith.mulf %190, %196 : vector<2x32xf32>
    %200 = arith.addf %198, %199 : vector<2x32xf32>
    %201 = math.tanh %200 : vector<2x32xf32>
    %202 = arith.mulf %197, %201 : vector<2x32xf32>
    %c8_i32 = arith.constant 8 : i32
    %cst_50 = arith.constant 0.000000e+00 : f32
    %203 = vector.broadcast %cst_50 : f32 to vector<2x32xf32>
    %204 = arith.maximumf %202, %203 : vector<2x32xf32>
    %205 = arith.truncf %204 : vector<2x32xf32> to vector<2x32xbf16>
    %c0_51 = arith.constant 0 : index
    %c0_52 = arith.constant 0 : index
    %206 = vector.load %arg3[%c0_51, %c0_52] : memref<32x128xbf16, #tpu.memory_space<vmem>>, vector<32x128xbf16>
    %cst_53 = arith.constant dense<0.000000e+00> : vector<2x128xf32>
    %207 = tpu.matmul %205, %206, %cst_53 {dimension_numbers = #tpu.dot_dimension_numbers<[1], [0], [0], [1], [0, 0, 1, 1], [], []>} : vector<2x32xbf16>, vector<32x128xbf16>, vector<2x128xf32> -> vector<2x128xf32>
    %c0_54 = arith.constant 0 : index
    %c0_55 = arith.constant 0 : index
    %208 = vector.load %arg4[%c0_54, %c0_55] : memref<1x128xf32, #tpu.memory_space<vmem>>, vector<1x128xf32>
    %209 = vector.broadcast %208 : vector<1x128xf32> to vector<2x128xf32>
    %210 = arith.addf %207, %209 : vector<2x128xf32>
    %c0_56 = arith.constant 0 : index
    %c0_57 = arith.constant 0 : index
    %211 = vector.load %arg5[%c0_56, %c0_57] : memref<2x128xf32, #tpu.memory_space<vmem>>, vector<2x128xf32>
    tpu.vector_store %arg5[%c0_56, %c0_57], %210 {strides = array<i32>} : memref<2x128xf32, #tpu.memory_space<vmem>>, vector<2x128xf32>,
    return
  }
  func.func @transform_0(%arg0: i32) -> (i32, i32, i32) {
    %c0_i32 = arith.constant 0 : i32
    %c0_i32_0 = arith.constant 0 : i32
    %c0_i32_1 = arith.constant 0 : i32
    return %c0_i32, %arg0, %c0_i32_0 : i32, i32, i32
  }
  func.func @transform_1(%arg0: i32) -> (i32, i32) {
    %c0_i32 = arith.constant 0 : i32
    %c0_i32_0 = arith.constant 0 : i32
    %c0_i32_1 = arith.constant 0 : i32
    return %c0_i32, %c0_i32_0 : i32, i32
  }
  func.func @transform_2(%arg0: i32) -> (i32, i32) {
    %c0_i32 = arith.constant 0 : i32
    %c0_i32_0 = arith.constant 0 : i32
    %c0_i32_1 = arith.constant 0 : i32
    return %c0_i32, %c0_i32_0 : i32, i32
  }
  func.func @transform_3(%arg0: i32) -> (i32, i32) {
    %c0_i32 = arith.constant 0 : i32
    %c0_i32_0 = arith.constant 0 : i32
    %c0_i32_1 = arith.constant 0 : i32
    return %c0_i32, %c0_i32_0 : i32, i32
  }
  func.func @transform_4(%arg0: i32) -> (i32, i32) {
    %c0_i32 = arith.constant 0 : i32
    %c0_i32_0 = arith.constant 0 : i32
    return %arg0, %c0_i32 : i32, i32
  }
}

</mosaic_0001>

<bundles_post_ra>
// kernel: tpu_custom_call.1
= control target key start
LH: loop header
LB: loop body
LE: loop exit
PB: predicated region body
PF: predicated region fallthrough
CT: control target
= control target key end

     0   :  { %9 = vsyncpa [#allocation3], 0  ;;  %s1244_s0 = inlined_call_operand.hbm [shape: bf16[8,2,128], index: 0, kind: input, shape index: {}]   ;;  %s1245_s1 = inlined_call_operand.hbm [shape: bf16[32,128], index: 1, kind: input, shape index: {}]   ;;  %s1246_s2 = inlined_call_operand.hbm [shape: bf16[32,128], index: 2, kind: input, shape index: {}]   ;;  %s1247_s3 = inlined_call_operand.vmem [shape: f32[1,128], index: 3, kind: input, shape index: {}]   ;;  %s1248_s4 = inlined_call_operand.hbm [shape: f32[2,128], index: 4, kind: output, shape index: {}]  }
   0x1   :  { %10 = vsyncpa [#allocation6], 0 }
   0x2   :  { %11 = vsyncpa [#allocation4], 0  ;;  %s1054_s15 = smov [#allocation5]   ;;  %s960_s19 = scalar_lea.hbm %s1245_s1, 256 }
   0x3   :  { %s29_s16 = sshll.u32 %s1054_s15, 4  ;;  %p961_p0 = scmp.ne.s32.totalorder %s1245_s1, %s960_s19  ;;  %s30_s16 = int_to_ptr.vmem [resolvable:$true] %s29_s16 }
   0x4   :  { %p964_p1 = scmp.lt.u32.totalorder %s960_s19, %s1245_s1 }
   0x6   :  { %p966_p2 = pnand %p964_p1, %p961_p0 }
   0x8   :  { %969 = shalt.err (!%p966_p2)
}
   0x9   :  { %s970_s24 = scalar_lea.vmem %s30_s16, 256  ;;  %p975_p4 = scmp.lt.s32.totalorder %s30_s16, %s30_s16 }
   0xa   :  { %p971_p3 = scmp.ne.s32.totalorder %s30_s16, %s970_s24  ;;  %p976_p5 = scmp.lt.s32.totalorder %s970_s24, %s970_s24 }
   0xc   :  { %p977_p6 = por %p976_p5, %p975_p4 }
   0xe   :  { %p978_p7 = pnand %p977_p6, %p971_p3 }
  0x10   :  { %981 = shalt.err (!%p978_p7)
}
  0x11   :  { %s1055_s25 = smov 64   ;;  %s1056_s26 = smov 4  }
  0x12   :  { %35 = dma.hbm_to_vmem [thread:$0]  %s1245_s1, 256, %s30_s16, [#allocation6], %s1055_s25, %s1055_s25, %s1056_s26  }
  0x13   :  { %s1057_s29 = smov [#allocation2]   ;;  %s982_s7 = scalar_lea.hbm %s1244_s0, 128 }
  0x14   :  { %s17_s30 = sshll.u32 %s1057_s29, 4  ;;  %p983_p8 = scmp.ne.s32.totalorder %s1244_s0, %s982_s7  ;;  %s18_s30 = int_to_ptr.vmem [resolvable:$true] %s17_s30 }
  0x15   :  { %p986_p9 = scmp.lt.u32.totalorder %s982_s7, %s1244_s0 }
  0x17   :  { %p988_p10 = pnand %p986_p9, %p983_p8 }
  0x19   :  { %991 = shalt.err (!%p988_p10)
}
  0x1a   :  { %s992_s12 = scalar_lea.vmem %s18_s30, 128  ;;  %p997_p12 = scmp.lt.s32.totalorder %s18_s30, %s18_s30 }
  0x1b   :  { %p993_p11 = scmp.ne.s32.totalorder %s18_s30, %s992_s12  ;;  %p998_p13 = scmp.lt.s32.totalorder %s992_s12, %s992_s12 }
  0x1d   :  { %p999_p0 = por %p998_p13, %p997_p12 }
  0x1f   :  { %p1000_p1 = pnand %p999_p0, %p993_p11 }
  0x21   :  { %1003 = shalt.err (!%p1000_p1)
}
  0x22   :  { %s1058_s1 = smov 16   ;;  %s1059_s13 = smov 1  }
  0x23   :  { %23 = dma.hbm_to_vmem [thread:$0]  %s1244_s0, 128, %s18_s30, [#allocation3], %s1058_s1, %s1058_s1, %s1059_s13  }
  0x24   :  { %s1060_s16 = smov [#allocation7]   ;;  %s1004_s20 = scalar_lea.hbm %s1246_s2, 256 }
  0x25   :  { %s41_s17 = sshll.u32 %s1060_s16, 4  ;;  %p1005_p2 = scmp.ne.s32.totalorder %s1246_s2, %s1004_s20  ;;  %s42_s17 = int_to_ptr.vmem [resolvable:$true] %s41_s17 }
  0x26   :  { %p1008_p3 = scmp.lt.u32.totalorder %s1004_s20, %s1246_s2 }
  0x28   :  { %p1010_p4 = pnand %p1008_p3, %p1005_p2 }
  0x2a   :  { %1013 = shalt.err (!%p1010_p4)
}
  0x2b   :  { %s1014_s27 = scalar_lea.vmem %s42_s17, 256  ;;  %p1019_p6 = scmp.lt.s32.totalorder %s42_s17, %s42_s17 }
  0x2c   :  { %p1015_p5 = scmp.ne.s32.totalorder %s42_s17, %s1014_s27  ;;  %p1020_p7 = scmp.lt.s32.totalorder %s1014_s27, %s1014_s27 }
  0x2e   :  { %p1021_p8 = por %p1020_p7, %p1019_p6 }
  0x30   :  { %p1022_p9 = pnand %p1021_p8, %p1015_p5 }
  0x32   :  { %1025 = shalt.err (!%p1022_p9)
}
  0x33   :  { %47 = dma.hbm_to_vmem [thread:$0]  %s1246_s2, 256, %s42_s17, [#allocation6], %s1055_s25, %s1055_s25, %s1056_s26  }
  0x34   :  { %1048 = dma.done.wait [#allocation3], 128  }
  0x35   :  { %1049 = vsyncadd [#allocation3], 4294967168 }
  0x36   :  { %1050 = dma.done.wait [#allocation6], 512  }
  0x37   :  { %1051 = vsyncadd [#allocation6], 4294966784  ;;  %v1061_v0 = vmov 0.0   ;;  %vm1062_vm0 = vmmov 0   ;;  %v1139_v1 = vld [vmem:[#allocation5] sm:$0xff]   ;;  %v1142_v2 = vld [vmem:[#allocation5 + $0x8] sm:$0xff]  }
  0x38   :  { %824 = vmatprep.subr.bf16.mxu0 %v1061_v0  ;;  %828 = vmatprep.mubr.msk.bf16.mxu0 %vm1062_vm0, %v1061_v0  ;;  %v1063_v3 = vmov 0   ;;  %v64_v4 = vld [vmem:[#allocation2] sm:$0x1]  ;;  %s1064_s2 = smov 32   ;;  %vm77_vm1 = vcmask 261120   ;;  %s1065_s30 = smov [#allocation8]  }
  0x39   :  { %832 = vmatprep.subr.bf16.mxu1 %v1061_v0  ;;  %836 = vmatprep.mubr.msk.bf16.mxu1 %vm1062_vm0, %v1061_v0  ;;  %v121_v5 = vunpack.c.l.bf16 %v64_v4  ;;  %v149_v27 = vld [vmem:[#allocation2 + $0x1] sm:$0x1]  ;;  %v225_v50 = vld [vmem:[#allocation2 + $0x2] sm:$0x1]  ;;  %s758_s5 = sshll.u32 %s1065_s30, 4  ;;  %s759_s5 = int_to_ptr.vmem [resolvable:$true] %s758_s5 }
  0x3a   :  { %825 = vmatpush3.bf16.msra.mxu0 %v1139_v1  ;;  %833 = vmatpush3.bf16.msra.mxu1 %v1139_v1  ;;  %v197_v28 = vunpack.c.l.bf16 %v149_v27  ;;  %v273_v51 = vunpack.c.l.bf16 %v225_v50  ;;  %p1031_p11 = scmp.lt.s32.totalorder %s759_s5, %s759_s5 }
  0x3b   :  { %826 = vmatprep.subr.bf16.mxu0 %v1061_v0  ;;  %834 = vmatprep.subr.bf16.mxu1 %v1061_v0 }
  0x3e   :  { %827 = vmatpush3.bf16.msra.mxu0 %v1142_v2  ;;  %835 = vmatpush3.bf16.msra.mxu1 %v1142_v2 }
  0x3f   :  { %840 = vmatprep.subr.bf16.mxu0 %v1061_v0  ;;  %848 = vmatprep.subr.bf16.mxu1 %v1061_v0 }
  0x41   :  { %829 = vmatmul.mubr.bf16.vlgmr.msra.gmra.mrb[0].mxu0 %v1063_v3 }
  0x42   :  { %841 = vmatpush3.bf16.msra.mxu0 %v1139_v1  ;;  %844 = vmatprep.mubr.msk.bf16.mxu0 %vm1062_vm0, %v1061_v0 }
  0x43   :  { %842 = vmatprep.subr.bf16.mxu0 %v1061_v0 }
  0x46   :  { %843 = vmatpush3.bf16.msra.mxu0 %v1142_v2 }
  0x47   :  { %856 = vmatprep.subr.bf16.mxu0 %v1061_v0 }
 0x114   :  { %v115_v6 = vpop.f32.mrb[0].mxu0 }
 0x115   :  { %v122_v7 = vadd.f32 %v121_v5, %v115_v6  ;;  %v830_v8 = vpop.f32.mrb[1].mxu0 }
 0x116   :  { %v118_v9 = vpop.f32.mrb[2].mxu0 }
 0x117   :  { %v770_v10 = vmul.f32 -1.442695, %v122_v7  ;;  %v831_v11 = vpop.f32.mrb[3].mxu0 }
 0x119   :  { %912 = vpow2.f32 %v770_v10 }
 0x123   :  { %v913_v12 = vpop.eup %912 }
 0x124   :  { %v126_v13 = vadd.f32 1.0, %v913_v12  ;;  %v301_v12 = vld [vmem:[#allocation2 + $0x3] sm:$0x1] }
 0x126   :  { %914 = vrcp.f32 %v126_v13  ;;  %v349_v13 = vunpack.c.l.bf16 %v301_v12 }
 0x130   :  { %v915_v14 = vpop.eup %914 }
 0x131   :  { %v129_v15 = vmul.f32 2.0, %v915_v14  ;;  %v131_v19 = vmul.f32 0.0, %v915_v14 }
 0x133   :  { %v771_v16 = vadd.f32 -1.0, %v129_v15 }
 0x135   :  { %133 = vrot.lane.b32.xlu0 %v771_v16, %s1055_s25 }
 0x1a7   :  { %v134_v17 = vpop.permute.xlu0 %133 }
 0x1a8   :  { %v136_v18 = vmul.f32 %v915_v14, %v134_v17 }
 0x1aa   :  { %138 = vrot.lane.b32.xlu0 %v136_v18, %s1064_s2 }
 0x21c   :  { %v139_v20 = vpop.permute.xlu0 %138 }
 0x21d   :  { %v141_v21 = vadd.f32 %v139_v20, %v131_v19 }
 0x21f   :  { %916 = vtanh.f32 %v141_v21 }
 0x229   :  { %v917_v22 = vpop.eup %916 }
 0x22a   :  { %144 = vrot.lane.b32.xlu1 %v917_v22, %s1055_s25 }
 0x29c   :  { %v145_v23 = vpop.permute.xlu1 %144 }
 0x29d   :  { %v147_v24 = vmul.f32 %v915_v14, %v145_v23 }
 0x29f   :  { %v150_v25 = vpack.c.bf16 %v147_v24, %v147_v24 }
 0x2a1   :  { %152 = vrot.lane.b32.xlu1 %v150_v25, %s1064_s2 }
 0x313   :  { %v153_v26 = vpop.permute.xlu1 %152 }
 0x314   :  { %837 = vmatmul.mubr.msk.bf16.vlgmr.msra.gmra.mrb[0].mxu1 %vm77_vm1, %v153_v26 }
 0x315   :  { %849 = vmatpush3.bf16.msra.mxu1 %v1139_v1  ;;  %852 = vmatprep.mubr.msk.bf16.mxu1 %vm1062_vm0, %v1061_v0 }
 0x316   :  { %850 = vmatprep.subr.bf16.mxu1 %v1061_v0 }
 0x319   :  { %851 = vmatpush3.bf16.msra.mxu1 %v1142_v2 }
 0x31a   :  { %864 = vmatprep.subr.bf16.mxu1 %v1061_v0 }
 0x3e7   :  { %v191_v29 = vpop.f32.mrb[0].mxu1 }
 0x3e8   :  { %v198_v30 = vadd.f32 %v197_v28, %v191_v29  ;;  %v838_v31 = vpop.f32.mrb[1].mxu1 }
 0x3e9   :  { %v194_v32 = vpop.f32.mrb[2].mxu1 }
 0x3ea   :  { %v773_v33 = vmul.f32 -1.442695, %v198_v30  ;;  %v839_v34 = vpop.f32.mrb[3].mxu1 }
 0x3ec   :  { %918 = vpow2.f32 %v773_v33 }
 0x3f6   :  { %v919_v35 = vpop.eup %918 }
 0x3f7   :  { %v202_v36 = vadd.f32 1.0, %v919_v35  ;;  %v377_v35 = vld [vmem:[#allocation2 + $0x4] sm:$0x1] }
 0x3f9   :  { %920 = vrcp.f32 %v202_v36  ;;  %v425_v36 = vunpack.c.l.bf16 %v377_v35 }
 0x403   :  { %v921_v37 = vpop.eup %920 }
 0x404   :  { %v205_v38 = vmul.f32 2.0, %v921_v37  ;;  %v207_v42 = vmul.f32 %v921_v37, %v141_v21 }
 0x406   :  { %v774_v39 = vadd.f32 -1.0, %v205_v38 }
 0x408   :  { %209 = vrot.lane.b32.xlu0 %v774_v39, %s1055_s25 }
 0x47a   :  { %v210_v40 = vpop.permute.xlu0 %209 }
 0x47b   :  { %v212_v41 = vmul.f32 %v921_v37, %v210_v40 }
 0x47d   :  { %214 = vrot.lane.b32.xlu1 %v212_v41, %s1064_s2 }
 0x4ef   :  { %v215_v43 = vpop.permute.xlu1 %214 }
 0x4f0   :  { %v217_v44 = vadd.f32 %v215_v43, %v207_v42 }
 0x4f2   :  { %922 = vtanh.f32 %v217_v44 }
 0x4fc   :  { %v923_v45 = vpop.eup %922 }
 0x4fd   :  { %220 = vrot.lane.b32.xlu0 %v923_v45, %s1055_s25 }
 0x56f   :  { %v221_v46 = vpop.permute.xlu0 %220 }
 0x570   :  { %v223_v47 = vmul.f32 %v921_v37, %v221_v46 }
 0x572   :  { %v226_v48 = vpack.c.bf16 %v223_v47, %v223_v47 }
 0x574   :  { %228 = vrot.lane.b32.xlu1 %v226_v48, %s1064_s2 }
 0x5e6   :  { %v229_v49 = vpop.permute.xlu1 %228 }
 0x5e7   :  { %845 = vmatmul.mubr.msk.bf16.vlgmr.msra.gmra.mrb[4].mxu0 %vm77_vm1, %v229_v49 }
 0x5e8   :  { %857 = vmatpush3.bf16.msra.mxu0 %v1139_v1  ;;  %860 = vmatprep.mubr.msk.bf16.mxu0 %vm1062_vm0, %v1061_v0 }
 0x5e9   :  { %858 = vmatprep.subr.bf16.mxu0 %v1061_v0 }
 0x5ec   :  { %859 = vmatpush3.bf16.msra.mxu0 %v1142_v2 }
 0x5ed   :  { %872 = vmatprep.subr.bf16.mxu0 %v1061_v0 }
 0x6ba   :  { %v267_v52 = vpop.f32.mrb[4].mxu0 }
 0x6bb   :  { %v274_v53 = vadd.f32 %v273_v51, %v267_v52  ;;  %v846_v54 = vpop.f32.mrb[5].mxu0 }
 0x6bc   :  { %v270_v55 = vpop.f32.mrb[6].mxu0 }
 0x6bd   :  { %v776_v56 = vmul.f32 -1.442695, %v274_v53  ;;  %v847_v57 = vpop.f32.mrb[7].mxu0 }
 0x6bf   :  { %924 = vpow2.f32 %v776_v56 }
 0x6c9   :  { %v925_v58 = vpop.eup %924 }
 0x6ca   :  { %v278_v59 = vadd.f32 1.0, %v925_v58  ;;  %v453_v58 = vld [vmem:[#allocation2 + $0x5] sm:$0x1] }
 0x6cc   :  { %926 = vrcp.f32 %v278_v59  ;;  %v501_v59 = vunpack.c.l.bf16 %v453_v58 }
 0x6d6   :  { %v927_v60 = vpop.eup %926 }
 0x6d7   :  { %v281_v61 = vmul.f32 2.0, %v927_v60  ;;  %v283_v4 = vmul.f32 %v927_v60, %v217_v44 }
 0x6d9   :  { %v777_v62 = vadd.f32 -1.0, %v281_v61 }
 0x6db   :  { %285 = vrot.lane.b32.xlu0 %v777_v62, %s1055_s25 }
 0x74d   :  { %v286_v63 = vpop.permute.xlu0 %285 }
 0x74e   :  { %v288_v3 = vmul.f32 %v927_v60, %v286_v63 }
 0x750   :  { %290 = vrot.lane.b32.xlu1 %v288_v3, %s1064_s2 }
 0x7c2   :  { %v291_v5 = vpop.permute.xlu1 %290 }
 0x7c3   :  { %v293_v6 = vadd.f32 %v291_v5, %v283_v4 }
 0x7c5   :  { %928 = vtanh.f32 %v293_v6 }
 0x7cf   :  { %v929_v7 = vpop.eup %928 }
 0x7d0   :  { %296 = vrot.lane.b32.xlu0 %v929_v7, %s1055_s25 }
 0x842   :  { %v297_v8 = vpop.permute.xlu0 %296 }
 0x843   :  { %v299_v9 = vmul.f32 %v927_v60, %v297_v8 }
 0x845   :  { %v302_v10 = vpack.c.bf16 %v299_v9, %v299_v9 }
 0x847   :  { %304 = vrot.lane.b32.xlu1 %v302_v10, %s1064_s2 }
 0x8b9   :  { %v305_v11 = vpop.permute.xlu1 %304 }
 0x8ba   :  { %853 = vmatmul.mubr.msk.bf16.vlgmr.msra.gmra.mrb[4].mxu1 %vm77_vm1, %v305_v11 }
 0x8bb   :  { %865 = vmatpush3.bf16.msra.mxu1 %v1139_v1  ;;  %868 = vmatprep.mubr.msk.bf16.mxu1 %vm1062_vm0, %v1061_v0 }
 0x8bc   :  { %866 = vmatprep.subr.bf16.mxu1 %v1061_v0 }
 0x8bf   :  { %867 = vmatpush3.bf16.msra.mxu1 %v1142_v2 }
 0x8c0   :  { %880 = vmatprep.subr.bf16.mxu1 %v1061_v0 }
 0x98d   :  { %v343_v14 = vpop.f32.mrb[4].mxu1 }
 0x98e   :  { %v350_v15 = vadd.f32 %v349_v13, %v343_v14  ;;  %v854_v16 = vpop.f32.mrb[5].mxu1 }
 0x98f   :  { %v346_v17 = vpop.f32.mrb[6].mxu1 }
 0x990   :  { %v779_v18 = vmul.f32 -1.442695, %v350_v15  ;;  %v855_v19 = vpop.f32.mrb[7].mxu1 }
 0x992   :  { %930 = vpow2.f32 %v779_v18  ;;  %v529_v18 = vld [vmem:[#allocation2 + $0x6] sm:$0x1] }
 0x993   :  { %v577_v19 = vunpack.c.l.bf16 %v529_v18 }
 0x99c   :  { %v931_v20 = vpop.eup %930 }
 0x99d   :  { %v354_v21 = vadd.f32 1.0, %v931_v20 }
 0x99f   :  { %932 = vrcp.f32 %v354_v21 }
 0x9a9   :  { %v933_v22 = vpop.eup %932 }
 0x9aa   :  { %v357_v23 = vmul.f32 2.0, %v933_v22  ;;  %v359_v27 = vmul.f32 %v933_v22, %v293_v6 }
 0x9ac   :  { %v780_v24 = vadd.f32 -1.0, %v357_v23 }
 0x9ae   :  { %361 = vrot.lane.b32.xlu0 %v780_v24, %s1055_s25 }
 0xa20   :  { %v362_v25 = vpop.permute.xlu0 %361 }
 0xa21   :  { %v364_v26 = vmul.f32 %v933_v22, %v362_v25 }
 0xa23   :  { %366 = vrot.lane.b32.xlu1 %v364_v26, %s1064_s2 }
 0xa95   :  { %v367_v28 = vpop.permute.xlu1 %366 }
 0xa96   :  { %v369_v29 = vadd.f32 %v367_v28, %v359_v27 }
 0xa98   :  { %934 = vtanh.f32 %v369_v29 }
 0xaa2   :  { %v935_v30 = vpop.eup %934 }
 0xaa3   :  { %372 = vrot.lane.b32.xlu0 %v935_v30, %s1055_s25 }
 0xb15   :  { %v373_v31 = vpop.permute.xlu0 %372 }
 0xb16   :  { %v375_v32 = vmul.f32 %v933_v22, %v373_v31 }
 0xb18   :  { %v378_v33 = vpack.c.bf16 %v375_v32, %v375_v32 }
 0xb1a   :  { %380 = vrot.lane.b32.xlu1 %v378_v33, %s1064_s2 }
 0xb8c   :  { %v381_v34 = vpop.permute.xlu1 %380 }
 0xb8d   :  { %861 = vmatmul.mubr.msk.bf16.vlgmr.msra.gmra.mrb[8].mxu0 %vm77_vm1, %v381_v34 }
 0xb8e   :  { %873 = vmatpush3.bf16.msra.mxu0 %v1139_v1  ;;  %876 = vmatprep.mubr.msk.bf16.mxu0 %vm1062_vm0, %v1061_v0 }
 0xb8f   :  { %874 = vmatprep.subr.bf16.mxu0 %v1061_v0 }
 0xb92   :  { %875 = vmatpush3.bf16.msra.mxu0 %v1142_v2 }
 0xb93   :  { %888 = vmatprep.subr.bf16.mxu0 %v1061_v0 }
 0xc60   :  { %v419_v37 = vpop.f32.mrb[8].mxu0 }
 0xc61   :  { %v426_v38 = vadd.f32 %v425_v36, %v419_v37  ;;  %v862_v39 = vpop.f32.mrb[9].mxu0 }
 0xc62   :  { %v422_v40 = vpop.f32.mrb[10].mxu0 }
 0xc63   :  { %v782_v41 = vmul.f32 -1.442695, %v426_v38  ;;  %v863_v42 = vpop.f32.mrb[11].mxu0 }
 0xc65   :  { %936 = vpow2.f32 %v782_v41  ;;  %v605_v41 = vld [vmem:[#allocation2 + $0x7] sm:$0x1] }
 0xc66   :  { %v653_v42 = vunpack.c.l.bf16 %v605_v41 }
 0xc6f   :  { %v937_v43 = vpop.eup %936 }
 0xc70   :  { %v430_v44 = vadd.f32 1.0, %v937_v43 }
 0xc72   :  { %938 = vrcp.f32 %v430_v44 }
 0xc7c   :  { %v939_v45 = vpop.eup %938 }
 0xc7d   :  { %v433_v46 = vmul.f32 2.0, %v939_v45  ;;  %v435_v50 = vmul.f32 %v939_v45, %v369_v29 }
 0xc7f   :  { %v783_v47 = vadd.f32 -1.0, %v433_v46 }
 0xc81   :  { %437 = vrot.lane.b32.xlu0 %v783_v47, %s1055_s25 }
 0xcf3   :  { %v438_v48 = vpop.permute.xlu0 %437 }
 0xcf4   :  { %v440_v49 = vmul.f32 %v939_v45, %v438_v48 }
 0xcf6   :  { %442 = vrot.lane.b32.xlu1 %v440_v49, %s1064_s2 }
 0xd68   :  { %v443_v51 = vpop.permute.xlu1 %442 }
 0xd69   :  { %v445_v52 = vadd.f32 %v443_v51, %v435_v50 }
 0xd6b   :  { %940 = vtanh.f32 %v445_v52 }
 0xd75   :  { %v941_v53 = vpop.eup %940 }
 0xd76   :  { %448 = vrot.lane.b32.xlu0 %v941_v53, %s1055_s25 }
 0xde8   :  { %v449_v54 = vpop.permute.xlu0 %448 }
 0xde9   :  { %v451_v55 = vmul.f32 %v939_v45, %v449_v54 }
 0xdeb   :  { %v454_v56 = vpack.c.bf16 %v451_v55, %v451_v55 }
 0xded   :  { %456 = vrot.lane.b32.xlu1 %v454_v56, %s1064_s2 }
 0xe5f   :  { %v457_v57 = vpop.permute.xlu1 %456 }
 0xe60   :  { %869 = vmatmul.mubr.msk.bf16.vlgmr.msra.gmra.mrb[8].mxu1 %vm77_vm1, %v457_v57 }
 0xe61   :  { %881 = vmatpush3.bf16.msra.mxu1 %v1139_v1  ;;  %884 = vmatprep.mubr.msk.bf16.mxu1 %vm1062_vm0, %v1061_v0 }
 0xe62   :  { %882 = vmatprep.subr.bf16.mxu1 %v1061_v0 }
 0xe65   :  { %883 = vmatpush3.bf16.msra.mxu1 %v1142_v2 }
 0xf33   :  { %v495_v60 = vpop.f32.mrb[8].mxu1 }
 0xf34   :  { %v502_v61 = vadd.f32 %v501_v59, %v495_v60  ;;  %v870_v62 = vpop.f32.mrb[9].mxu1  ;;  %v910_v59 = vld [vmem:[#allocation7] sm:$0xff]   ;;  %v911_v60 = vld [vmem:[#allocation7 + $0x8] sm:$0xff]  }
 0xf35   :  { %v498_v63 = vpop.f32.mrb[10].mxu1 }
 0xf36   :  { %v785_v3 = vmul.f32 -1.442695, %v502_v61  ;;  %v871_v4 = vpop.f32.mrb[11].mxu1 }
 0xf38   :  { %942 = vpow2.f32 %v785_v3 }
 0xf42   :  { %v943_v5 = vpop.eup %942 }
 0xf43   :  { %v506_v6 = vadd.f32 1.0, %v943_v5 }
 0xf45   :  { %944 = vrcp.f32 %v506_v6  ;;  %v793_v6 = vld [vmem:[%s1247_s3] ss:$0 sm:$0xff] }
 0xf4f   :  { %v945_v1 = vpop.eup %944 }
 0xf50   :  { %v509_v7 = vmul.f32 2.0, %v945_v1  ;;  %v511_v2 = vmul.f32 %v945_v1, %v445_v52 }
 0xf52   :  { %v786_v8 = vadd.f32 -1.0, %v509_v7 }
 0xf54   :  { %513 = vrot.lane.b32.xlu0 %v786_v8, %s1055_s25 }
 0xfc6   :  { %v514_v9 = vpop.permute.xlu0 %513 }
 0xfc7   :  { %v516_v10 = vmul.f32 %v945_v1, %v514_v9 }
 0xfc9   :  { %518 = vrot.lane.b32.xlu1 %v516_v10, %s1064_s2 }
0x103b   :  { %v519_v11 = vpop.permute.xlu1 %518 }
0x103c   :  { %v521_v12 = vadd.f32 %v519_v11, %v511_v2 }
0x103e   :  { %946 = vtanh.f32 %v521_v12 }
0x1048   :  { %v947_v13 = vpop.eup %946 }
0x1049   :  { %524 = vrot.lane.b32.xlu0 %v947_v13, %s1055_s25 }
0x10bb   :  { %v525_v14 = vpop.permute.xlu0 %524 }
0x10bc   :  { %v527_v15 = vmul.f32 %v945_v1, %v525_v14 }
0x10be   :  { %v530_v16 = vpack.c.bf16 %v527_v15, %v527_v15 }
0x10c0   :  { %532 = vrot.lane.b32.xlu1 %v530_v16, %s1064_s2 }
0x1132   :  { %v533_v17 = vpop.permute.xlu1 %532 }
0x1133   :  { %877 = vmatmul.mubr.msk.bf16.vlgmr.msra.gmra.mrb[12].mxu0 %vm77_vm1, %v533_v17 }
0x1134   :  { %892 = vmatprep.mubr.msk.bf16.mxu0 %vm1062_vm0, %v1061_v0  ;;  %889 = vmatpush3.bf16.msra.mxu0 %v910_v59 }
0x1135   :  { %890 = vmatprep.subr.bf16.mxu0 %v1061_v0 }
0x1138   :  { %891 = vmatpush3.bf16.msra.mxu0 %v911_v60 }
0x1206   :  { %v571_v20 = vpop.f32.mrb[12].mxu0 }
0x1207   :  { %v578_v21 = vadd.f32 %v577_v19, %v571_v20  ;;  %v878_v22 = vpop.f32.mrb[13].mxu0 }
0x1208   :  { %v574_v23 = vpop.f32.mrb[14].mxu0 }
0x1209   :  { %v788_v24 = vmul.f32 -1.442695, %v578_v21  ;;  %v879_v25 = vpop.f32.mrb[15].mxu0 }
0x120b   :  { %948 = vpow2.f32 %v788_v24 }
0x1215   :  { %v949_v26 = vpop.eup %948 }
0x1216   :  { %v582_v27 = vadd.f32 1.0, %v949_v26 }
0x1218   :  { %950 = vrcp.f32 %v582_v27 }
0x1222   :  { %v951_v28 = vpop.eup %950 }
0x1223   :  { %v585_v29 = vmul.f32 2.0, %v951_v28  ;;  %v587_v33 = vmul.f32 %v951_v28, %v521_v12 }
0x1225   :  { %v789_v30 = vadd.f32 -1.0, %v585_v29 }
0x1227   :  { %589 = vrot.lane.b32.xlu0 %v789_v30, %s1055_s25 }
0x1299   :  { %v590_v31 = vpop.permute.xlu0 %589 }
0x129a   :  { %v592_v32 = vmul.f32 %v951_v28, %v590_v31 }
0x129c   :  { %594 = vrot.lane.b32.xlu1 %v592_v32, %s1064_s2 }
0x130e   :  { %v595_v34 = vpop.permute.xlu1 %594 }
0x130f   :  { %v597_v35 = vadd.f32 %v595_v34, %v587_v33 }
0x1311   :  { %952 = vtanh.f32 %v597_v35 }
0x131b   :  { %v953_v36 = vpop.eup %952 }
0x131c   :  { %600 = vrot.lane.b32.xlu0 %v953_v36, %s1055_s25 }
0x138e   :  { %v601_v37 = vpop.permute.xlu0 %600 }
0x138f   :  { %v603_v38 = vmul.f32 %v951_v28, %v601_v37 }
0x1391   :  { %v606_v39 = vpack.c.bf16 %v603_v38, %v603_v38 }
0x1393   :  { %608 = vrot.lane.b32.xlu1 %v606_v39, %s1064_s2 }
0x1405   :  { %v609_v40 = vpop.permute.xlu1 %608 }
0x1406   :  { %885 = vmatmul.mubr.msk.bf16.vlgmr.msra.gmra.mrb[12].mxu1 %vm77_vm1, %v609_v40 }
0x14d9   :  { %v647_v43 = vpop.f32.mrb[12].mxu1 }
0x14da   :  { %v654_v44 = vadd.f32 %v653_v42, %v647_v43  ;;  %v886_v45 = vpop.f32.mrb[13].mxu1 }
0x14db   :  { %v650_v46 = vpop.f32.mrb[14].mxu1 }
0x14dc   :  { %v791_v47 = vmul.f32 -1.442695, %v654_v44  ;;  %v887_v48 = vpop.f32.mrb[15].mxu1 }
0x14de   :  { %954 = vpow2.f32 %v791_v47 }
0x14e8   :  { %v955_v49 = vpop.eup %954 }
0x14e9   :  { %v658_v50 = vadd.f32 1.0, %v955_v49 }
0x14eb   :  { %956 = vrcp.f32 %v658_v50 }
0x14f5   :  { %v957_v51 = vpop.eup %956 }
0x14f6   :  { %v661_v52 = vmul.f32 2.0, %v957_v51  ;;  %v663_v56 = vmul.f32 %v957_v51, %v597_v35 }
0x14f8   :  { %v792_v53 = vadd.f32 -1.0, %v661_v52 }
0x14fa   :  { %665 = vrot.lane.b32.xlu0 %v792_v53, %s1055_s25 }
0x156c   :  { %v666_v54 = vpop.permute.xlu0 %665 }
0x156d   :  { %v668_v55 = vmul.f32 %v957_v51, %v666_v54 }
0x156f   :  { %670 = vrot.lane.b32.xlu1 %v668_v55, %s1064_s2 }
0x15e1   :  { %v671_v57 = vpop.permute.xlu1 %670 }
0x15e2   :  { %v673_v58 = vadd.f32 %v671_v57, %v663_v56 }
0x15e4   :  { %958 = vtanh.f32 %v673_v58 }
0x15ee   :  { %v959_v61 = vpop.eup %958 }
0x15ef   :  { %676 = vrot.lane.b32.xlu0 %v959_v61, %s1055_s25  ;;  %s1026_s25 = scalar_lea.vmem %s759_s5, 32 }
0x15f0   :  { %p1027_p10 = scmp.ne.s32.totalorder %s759_s5, %s1026_s25  ;;  %p1032_p12 = scmp.lt.s32.totalorder %s1026_s25, %s1026_s25 }
0x15f2   :  { %p1033_p13 = por %p1032_p12, %p1031_p11 }
0x15f4   :  { %p1034_p0 = pnand %p1033_p13, %p1027_p10 }
0x1661   :  { %v677_v62 = vpop.permute.xlu0 %676 }
0x1662   :  { %v679_v63 = vmul.f32 %v957_v51, %v677_v62 }
0x1664   :  { %v680_v3 = vmax.f32 %v679_v63, 0.0 }
0x1666   :  { %v681_v4 = vpack.c.bf16 %v680_v3, %v680_v3 }
0x1668   :  { %694 = vrot.lane.b32.xlu1 %v681_v4, %s1064_s2 }
0x16da   :  { %v695_v5 = vpop.permute.xlu1 %694 }
0x16db   :  { %893 = vmatmul.mubr.msk.bf16.vlgmr.msra.gmra.mrb[16].mxu0 %vm77_vm1, %v695_v5 }
0x17ae   :  { %v745_v0 = vpop.f32.mrb[16].mxu0 }
0x17af   :  { %v746_v1 = vadd.f32 %v793_v6, %v745_v0  ;;  %v894_v7 = vpop.f32.mrb[17].mxu0 }
0x17b0   :  { %v748_v8 = vpop.f32.mrb[18].mxu0 }
0x17b1   :  { %751 = vst [vmem:[#allocation8] sm:$0x3] %v746_v1  ;;  %v895_v9 = vpop.f32.mrb[19].mxu0 }
0x17b2   :  { %1037 = shalt.err (!%p1034_p0)
}
0x17b3   :  { %s1038_s3 = scalar_lea.hbm %s1248_s4, 32 }
0x17b4   :  { %p1039_p1 = scmp.ne.s32.totalorder %s1248_s4, %s1038_s3  ;;  %p1042_p2 = scmp.lt.u32.totalorder %s1038_s3, %s1248_s4 }
0x17b6   :  { %p1044_p3 = pnand %p1042_p2, %p1039_p1 }
0x17b8   :  { %1047 = shalt.err (!%p1044_p3)
}
0x17b9   :  { %761 = dma.vmem_to_hbm [thread:$0]  %s759_s5, 32, %s1248_s4, [#allocation4]  }
0x17ba   :  { %1052 = dma.done.wait [#allocation4], 32  }
0x17bb   :  { %1053 = vsyncadd [#allocation4], 4294967264 }
0x17bc   :  { %765 = vsyncpa [#allocation3], 1 }
0x17bd   :  { %766 = vsyncpa [#allocation6], 1 }
0x17be   :  { %767 = vsyncpa [#allocation4], 1 }

</bundles_post_ra>
